<compile_context>
chip_gen: v5e
topology: v5e:2x2
jax: 0.10.0
libtpu: 0.0.40
codegen_flags: <defaults>
</compile_context>

<pallas_src>
import functools

import jax
import jax.numpy as jnp
from jax.experimental import pallas as pl
from jax.experimental.pallas import tpu as pltpu


def _round_up(x, m):
    return (x + m - 1) // m * m


# ----------------------------------------------------------------------------
# Fused matmul kernels
# ----------------------------------------------------------------------------
def _mm_single_kernel(a_ref, b_ref, scale_ref, shift_ref, *rest, relu, has_res):
    """Single K-step: no accumulator scratch, write the tile directly."""
    if has_res:
        res_ref, o_ref = rest
    else:
        (o_ref,) = rest
    acc = jnp.dot(a_ref[...], b_ref[...], preferred_element_type=jnp.float32)
    out = acc * scale_ref[...] + shift_ref[...]
    if has_res:
        out = out + res_ref[...].astype(jnp.float32)
    if relu:
        out = jnp.maximum(out, 0.0)
    o_ref[...] = out.astype(o_ref.dtype)


def _mm_multi_kernel(a_ref, b_ref, scale_ref, shift_ref, *rest, relu, has_res):
    """Multi K-step: f32 accumulator scratch, epilogue on the last K step."""
    if has_res:
        res_ref, o_ref, acc_ref = rest
    else:
        o_ref, acc_ref = rest

    @pl.when(pl.program_id(2) == 0)
    def _():
        acc_ref[...] = jnp.zeros_like(acc_ref)

    acc_ref[...] += jnp.dot(a_ref[...], b_ref[...],
                            preferred_element_type=jnp.float32)

    @pl.when(pl.program_id(2) == pl.num_programs(2) - 1)
    def _():
        out = acc_ref[...] * scale_ref[...] + shift_ref[...]
        if has_res:
            out = out + res_ref[...].astype(jnp.float32)
        if relu:
            out = jnp.maximum(out, 0.0)
        o_ref[...] = out.astype(o_ref.dtype)


def matmul_fused(a, b, scale, shift, res=None, *, relu, out_dtype=jnp.bfloat16):
    """A:[M,K] @ B:[K,N]; scale/shift:[N] broadcast over rows; optional res:[M,N]."""
    M, K = a.shape
    _, N = b.shape
    has_res = res is not None

    # Feed the MXU bf16; accumulate in f32 inside the kernel.
    a = a.astype(jnp.bfloat16)
    b = b.astype(jnp.bfloat16)

    Mp = max(_round_up(M, 8), 8)          # only sublane alignment; no 512-rounding
    Np = _round_up(N, 128)
    single = K <= 2048                    # single K-step: no acc scratch needed
    Kp = _round_up(K, 8) if single else _round_up(K, 128)

    if Mp != M or Kp != K:
        a = jnp.pad(a, ((0, Mp - M), (0, Kp - K)))
    if Kp != K or Np != N:
        b = jnp.pad(b, ((0, Kp - K), (0, Np - N)))
    scale = scale.reshape(1, -1).astype(jnp.float32)
    shift = shift.reshape(1, -1).astype(jnp.float32)
    if Np != N:
        scale = jnp.pad(scale, ((0, 0), (0, Np - N)))
        shift = jnp.pad(shift, ((0, 0), (0, Np - N)))
    if has_res:
        res = res.astype(jnp.bfloat16)
        if Mp != M or Np != N:
            res = jnp.pad(res, ((0, Mp - M), (0, Np - N)))

    tm = Mp if Mp <= 512 else 512
    tn = 512 if (Np % 512 == 0 and Np >= 1024) else (256 if Np % 256 == 0 else 128)
    grid_m = pl.cdiv(Mp, tm)              # partial last M tile: OOB writes are masked
    grid_n = Np // tn

    if single:
        tk = Kp
        grid = (grid_m, grid_n)
        in_specs = [
            pl.BlockSpec((tm, tk), lambda i, j: (i, 0)),
            pl.BlockSpec((tk, tn), lambda i, j: (0, j)),
            pl.BlockSpec((1, tn), lambda i, j: (0, j)),
            pl.BlockSpec((1, tn), lambda i, j: (0, j)),
        ]
        if has_res:
            in_specs.append(pl.BlockSpec((tm, tn), lambda i, j: (i, j)))
        out_spec = pl.BlockSpec((tm, tn), lambda i, j: (i, j))
        scratch = []
        kernel = functools.partial(_mm_single_kernel, relu=relu, has_res=has_res)
        dims = ("parallel", "parallel")
    else:
        tk = 512 if Kp % 512 == 0 else (256 if Kp % 256 == 0 else 128)
        grid = (grid_m, grid_n, Kp // tk)
        in_specs = [
            pl.BlockSpec((tm, tk), lambda i, j, k: (i, k)),
            pl.BlockSpec((tk, tn), lambda i, j, k: (k, j)),
            pl.BlockSpec((1, tn), lambda i, j, k: (0, j)),
            pl.BlockSpec((1, tn), lambda i, j, k: (0, j)),
        ]
        if has_res:
            in_specs.append(pl.BlockSpec((tm, tn), lambda i, j, k: (i, j)))
        out_spec = pl.BlockSpec((tm, tn), lambda i, j, k: (i, j))
        scratch = [pltpu.VMEM((tm, tn), jnp.float32)]
        kernel = functools.partial(_mm_multi_kernel, relu=relu, has_res=has_res)
        dims = ("parallel", "parallel", "arbitrary")

    args = (a, b, scale, shift) + ((res,) if has_res else ())
    out = pl.pallas_call(
        kernel,
        out_shape=jax.ShapeDtypeStruct((Mp, Np), out_dtype),
        grid_spec=pltpu.PrefetchScalarGridSpec(
            num_scalar_prefetch=0, grid=grid,
            in_specs=in_specs, out_specs=out_spec, scratch_shapes=scratch),
        compiler_params=pltpu.CompilerParams(
            dimension_semantics=dims,
            vmem_limit_bytes=32 * 1024 * 1024),
    )(*args)
    return out[:M, :N]


# ----------------------------------------------------------------------------
# Max-pool 3x3 / stride 2 / pad 1 — tiled, pipelined 9-way max kernel
# ----------------------------------------------------------------------------
def _max9_kernel(*refs):
    o_ref = refs[-1]
    m = refs[0][...]
    for r in refs[1:-1]:
        m = jnp.maximum(m, r[...])
    o_ref[...] = m


@jax.jit
def maxpool_3x3_s2_p1(x):  # x: NHWC
    N, H, W, C = x.shape
    OH = (H + 2 - 3) // 2 + 1
    OW = (W + 2 - 3) // 2 + 1
    # TODO(synk): read the padded activation once with strided in-kernel access
    # (manual DMA) instead of materializing 9 shifted output-sized views.
    xp = jnp.pad(x, ((0, 0), (1, 1), (1, 1), (0, 0)),
                 constant_values=float(jnp.finfo(x.dtype).min))
    views = []
    for i in range(3):
        for j in range(3):
            v = xp[:, i:i + 2 * (OH - 1) + 1:2, j:j + 2 * (OW - 1) + 1:2, :]
            views.append(v.reshape(N * OH * OW, C))
    M = N * OH * OW
    tm = min(512, M) if M % 8 == 0 else M
    out = pl.pallas_call(
        _max9_kernel,
        out_shape=jax.ShapeDtypeStruct((M, C), x.dtype),
        grid_spec=pltpu.PrefetchScalarGridSpec(
            num_scalar_prefetch=0, grid=(pl.cdiv(M, tm),),
            in_specs=[pl.BlockSpec((tm, C), lambda i: (i, 0))] * 9,
            out_specs=pl.BlockSpec((tm, C), lambda i: (i, 0))),
        compiler_params=pltpu.CompilerParams(
            dimension_semantics=("parallel",),
            vmem_limit_bytes=32 * 1024 * 1024),
    )(*views)
    return out.reshape(N, OH, OW, C)


# ----------------------------------------------------------------------------
# BN folding / conv / conv-transpose (sub-pixel) / bilinear resize
# ----------------------------------------------------------------------------
def bn_fold(bn, bias=None, eps=1e-5):
    s = bn["gamma"] / jnp.sqrt(bn["var"] + eps)
    b = bn["beta"] - bn["mean"] * s
    if bias is not None:
        b = b + bias * s
    return s, b


@functools.partial(jax.jit, static_argnames=("stride", "pad", "relu"))
def conv2d_bn_act(x, w, scale, shift, res=None, *, stride, pad, relu):
    """x: [N,H,W,Cin] NHWC (bf16); w: [Cout,Cin,kh,kw] (PyTorch layout)."""
    N, H, W, Cin = x.shape
    Cout, _, kh, kw = w.shape
    OH = (H + 2 * pad - kh) // stride + 1
    OW = (W + 2 * pad - kw) // stride + 1
    if kh == 1 and kw == 1 and pad == 0:
        xs = x if stride == 1 else x[:, ::stride, ::stride, :]
        a = xs.reshape(N * OH * OW, Cin)
    else:
        # TODO(synk): fold the kh*kw taps into the kernel's K grid axis (manual
        # DMA / element-offset indexing) to avoid materializing im2col in HBM.
        xp = jnp.pad(x, ((0, 0), (pad, pad), (pad, pad), (0, 0)))
        cols = []
        for i in range(kh):
            for j in range(kw):
                cols.append(xp[:, i:i + stride * (OH - 1) + 1:stride,
                               j:j + stride * (OW - 1) + 1:stride, :])
        a = jnp.concatenate(cols, axis=-1).reshape(N * OH * OW, kh * kw * Cin)
    b = jnp.transpose(w, (2, 3, 1, 0)).reshape(kh * kw * Cin, Cout)
    res_m = None if res is None else res.reshape(N * OH * OW, Cout)
    out = matmul_fused(a, b, scale, shift, res_m, relu=relu)
    return out.reshape(N, OH, OW, Cout)


def _phase_taps(r, stride, pad, k):
    """1-D sub-pixel taps for output phase r: list of (input shift d, kernel idx ky)."""
    taps = []
    ky = (r + pad) % stride
    base = (r + pad) // stride
    j = 0
    while ky + stride * j < k:
        taps.append((base - j, ky + stride * j))
        j += 1
    return taps


def _shifted(x, dy, dx):
    """y[:, q, r] = x[:, q+dy, r+dx] (zero outside bounds)."""
    N, H, W, C = x.shape
    pyl, pyh = max(-dy, 0), max(dy, 0)
    pxl, pxh = max(-dx, 0), max(dx, 0)
    if pyl or pyh or pxl or pxh:
        x = jnp.pad(x, ((0, 0), (pyl, pyh), (pxl, pxh), (0, 0)))
    return x[:, pyl + dy:pyl + dy + H, pxl + dx:pxl + dx + W, :]


@functools.partial(jax.jit, static_argnames=("stride", "pad", "out_pad"))
def conv_transpose_bn_relu(x, w_t, bias, bn, *, stride, pad, out_pad):
    """Sub-pixel ConvTranspose2d + BN + ReLU; w_t: [Cin,Cout,kh,kw] (PyTorch layout).

    Each output phase (oy%s, ox%s) is a tiny stride-1 conv over the UNdilated
    input (<= 2x2 taps here), so no zero-dilated activation is ever built.
    """
    N, H, W, Cin = x.shape
    _, Cout, kh, kw = w_t.shape
    s = stride
    assert (H - 1) * s - 2 * pad + kh + out_pad == s * H
    assert (W - 1) * s - 2 * pad + kw + out_pad == s * W
    scale, shift = bn_fold(bn, bias=bias)
    x = x.astype(jnp.bfloat16)
    rows = []
    for ry in range(s):
        taps_y = _phase_taps(ry, s, pad, kh)
        row = []
        for rx in range(s):
            taps_x = _phase_taps(rx, s, pad, kw)
            a_parts, b_parts = [], []
            for dy, ky in taps_y:
                for dx, kx in taps_x:
                    a_parts.append(_shifted(x, dy, dx))
                    b_parts.append(w_t[:, :, ky, kx])          # [Cin, Cout]
            a = jnp.concatenate(a_parts, axis=-1).reshape(N * H * W, -1)
            b = jnp.concatenate(b_parts, axis=0)                # [T*Cin, Cout]
            o = matmul_fused(a, b, scale, shift, None, relu=True)
            row.append(o.reshape(N, H, W, Cout))
        rows.append(jnp.stack(row, axis=0))
    stacked = jnp.stack(rows, axis=0)                           # [s,s,N,H,W,Cout]
    return stacked.transpose(2, 3, 0, 4, 1, 5).reshape(N, s * H, s * W, Cout)


def _bilinear_matrix(in_size, out_size):                        # align_corners=True
    d = jnp.arange(out_size, dtype=jnp.float32)
    sc = (in_size - 1) / (out_size - 1) if out_size > 1 else 0.0
    src = d * sc
    i0 = jnp.clip(jnp.floor(src).astype(jnp.int32), 0, in_size - 1)
    i1 = jnp.minimum(i0 + 1, in_size - 1)
    l1 = src - i0.astype(jnp.float32)
    l0 = 1.0 - l1
    return (l0[:, None] * jax.nn.one_hot(i0, in_size, dtype=jnp.float32)
            + l1[:, None] * jax.nn.one_hot(i1, in_size, dtype=jnp.float32))


@functools.partial(jax.jit, static_argnames=("factor",))
def bilinear_upsample(x, *, factor):  # NHWC -> NHWC (f32), align_corners=True
    # TODO(synk): replace the two small matmuls with a VPU gather+lerp kernel.
    N, H, W, C = x.shape
    OH, OW = H * factor, W * factor
    wh = _bilinear_matrix(H, OH)
    ww = _bilinear_matrix(W, OW)
    t = x.transpose(0, 1, 3, 2).reshape(N * H * C, W)
    t = matmul_fused(t, ww.T, jnp.ones((OW,), jnp.float32),
                     jnp.zeros((OW,), jnp.float32), None, relu=False)
    t = t.reshape(N, H, C, OW).transpose(0, 2, 3, 1).reshape(N * C * OW, H)
    t = matmul_fused(t, wh.T, jnp.ones((OH,), jnp.float32),
                     jnp.zeros((OH,), jnp.float32), None, relu=False,
                     out_dtype=jnp.float32)
    return t.reshape(N, C, OW, OH).transpose(0, 3, 2, 1)


# ----------------------------------------------------------------------------
# Parameters (deterministic synthetic init) and forward pass
# ----------------------------------------------------------------------------
class _KeyGen:
    def __init__(self, seed):
        self._key = jax.random.PRNGKey(seed)

    def __call__(self):
        self._key, k = jax.random.split(self._key)
        return k


def _conv_w(kg, cout, cin, kh, kw):
    fan_in = float(cin * kh * kw)
    return jax.random.normal(kg(), (cout, cin, kh, kw), jnp.float32) / jnp.sqrt(fan_in)


def _bn_p(c):
    return dict(gamma=jnp.ones((c,), jnp.float32), beta=jnp.zeros((c,), jnp.float32),
                mean=jnp.zeros((c,), jnp.float32), var=jnp.ones((c,), jnp.float32))


def init_resnet_deep_params(seed=0, n_classes=2):
    kg = _KeyGen(seed)
    P = {"conv1": _conv_w(kg, 64, 3, 7, 7), "bn1": _bn_p(64)}
    inplanes = 64
    for li, (planes, nblocks) in enumerate([(64, 3), (128, 4), (256, 6), (512, 3)],
                                           start=1):
        blocks = []
        for bi in range(nblocks):
            blk = {"conv1": _conv_w(kg, planes, inplanes, 1, 1), "bn1": _bn_p(planes),
                   "conv2": _conv_w(kg, planes, planes, 3, 3), "bn2": _bn_p(planes),
                   "conv3": _conv_w(kg, planes * 4, planes, 1, 1), "bn3": _bn_p(planes * 4)}
            if bi == 0:  # downsample branch (channel and/or stride change)
                blk["dconv"] = _conv_w(kg, planes * 4, inplanes, 1, 1)
                blk["dbn"] = _bn_p(planes * 4)
            blocks.append(blk)
            inplanes = planes * 4
        P[f"layer{li}"] = blocks
    # upscale3: ConvTranspose2d(1024, 512, 3, s=2, p=1, op=1) + BN + ReLU
    P["up3_w"] = jax.random.normal(kg(), (1024, 512, 3, 3), jnp.float32) / jnp.sqrt(1024.0 * 9.0)
    P["up3_b"] = jnp.zeros((512,), jnp.float32)
    P["up3_bn"] = _bn_p(512)
    # upscale4: ConvTranspose2d(2048, 512, 7, s=4, p=3, op=3) + BN + ReLU
    P["up4_w"] = jax.random.normal(kg(), (2048, 512, 7, 7), jnp.float32) / jnp.sqrt(2048.0 * 49.0)
    P["up4_b"] = jnp.zeros((512,), jnp.float32)
    P["up4_bn"] = _bn_p(512)
    # classifier: Conv2d(1536, n_classes, 1)
    P["cls_w"] = _conv_w(kg, n_classes, 3 * 512, 1, 1)
    P["cls_b"] = jnp.zeros((n_classes,), jnp.float32)
    return P


def bottleneck_forward(x, p, *, stride):
    s1, b1 = bn_fold(p["bn1"])
    h = conv2d_bn_act(x, p["conv1"], s1, b1, None, stride=1, pad=0, relu=True)
    s2, b2 = bn_fold(p["bn2"])
    h = conv2d_bn_act(h, p["conv2"], s2, b2, None, stride=stride, pad=1, relu=True)
    if "dconv" in p:
        sd, bd = bn_fold(p["dbn"])
        identity = conv2d_bn_act(x, p["dconv"], sd, bd, None,
                                 stride=stride, pad=0, relu=False)
    else:
        identity = x
    s3, b3 = bn_fold(p["bn3"])
    # conv3 + BN + residual add + ReLU fused in the Pallas matmul epilogue
    return conv2d_bn_act(h, p["conv3"], s3, b3, identity, stride=1, pad=0, relu=True)


def resnet_deep_forward(params, x_nchw):
    x = jnp.transpose(x_nchw, (0, 2, 3, 1)).astype(jnp.bfloat16)  # NCHW -> NHWC bf16
    s, b = bn_fold(params["bn1"])
    x = conv2d_bn_act(x, params["conv1"], s, b, None, stride=2, pad=3, relu=True)
    x = maxpool_3x3_s2_p1(x)

    def run_layer(h, blocks, first_stride):
        for bi, blk in enumerate(blocks):
            h = bottleneck_forward(h, blk, stride=first_stride if bi == 0 else 1)
        return h

    x1 = run_layer(x, params["layer1"], 1)
    x2 = run_layer(x1, params["layer2"], 2)
    x3 = run_layer(x2, params["layer3"], 2)
    x4 = run_layer(x3, params["layer4"], 2)

    x3u = conv_transpose_bn_relu(x3, params["up3_w"], params["up3_b"],
                                 params["up3_bn"], stride=2, pad=1, out_pad=1)
    x4u = conv_transpose_bn_relu(x4, params["up4_w"], params["up4_b"],
                                 params["up4_bn"], stride=4, pad=3, out_pad=3)
    xall = jnp.concatenate([x2, x3u, x4u], axis=-1)   # channel cat (dim=1 in NCHW)
    n_classes = params["cls_w"].shape[0]
    score = conv2d_bn_act(xall, params["cls_w"],
                          jnp.ones((n_classes,), jnp.float32), params["cls_b"],
                          None, stride=1, pad=0, relu=False)
    out = bilinear_upsample(score, factor=8)          # align_corners=True, x8
    return jnp.transpose(out, (0, 3, 1, 2)).astype(jnp.float32)  # NHWC -> NCHW


if __name__ == "__main__":
    # Small but structurally valid shapes: input must be divisible by 32.
    params = init_resnet_deep_params(seed=0, n_classes=2)
    x = jax.random.normal(jax.random.PRNGKey(0), (2, 3, 32, 32), jnp.float32)
    out = jax.block_until_ready(resnet_deep_forward(params, x))
    assert out.shape == (2, 2, 32, 32), out.shape
    assert bool(jnp.all(jnp.isfinite(out)))
    print("KERNEL_OK")
</pallas_src>

<mosaic_0001>
module attributes {stable_mosaic.version = 11 : i64} {
  func.func @_mm_single_kernel(%arg0: i32, %arg1: i32, %arg2: memref<512x152xbf16, #tpu.memory_space<vmem>>, %arg3: memref<152x128xbf16, #tpu.memory_space<vmem>>, %arg4: memref<1x128xf32, #tpu.memory_space<vmem>>, %arg5: memref<1x128xf32, #tpu.memory_space<vmem>>, %arg6: memref<512x128xbf16, #tpu.memory_space<vmem>>) attributes {dimension_semantics = [#tpu.dimension_semantics<parallel>, #tpu.dimension_semantics<parallel>], iteration_bounds = array<i64: 1, 1>, scalar_prefetch = 0 : i64, scratch_operands = 0 : i64, tpu.core_type = #tpu.core_type<tc>, window_params = [{transform_indices = @transform_0, window_bounds = array<i64: 512, 152>}, {transform_indices = @transform_1, window_bounds = array<i64: 152, 128>}, {transform_indices = @transform_2, window_bounds = array<i64: 1, 128>}, {transform_indices = @transform_3, window_bounds = array<i64: 1, 128>}, {transform_indices = @transform_4, window_bounds = array<i64: 512, 128>}]} {
    %c0 = arith.constant 0 : index
    %c0_0 = arith.constant 0 : index
    %0 = vector.load %arg2[%c0, %c0_0] : memref<512x152xbf16, #tpu.memory_space<vmem>>, vector<512x152xbf16>
    %c0_1 = arith.constant 0 : index
    %c0_2 = arith.constant 0 : index
    %1 = vector.load %arg3[%c0_1, %c0_2] : memref<152x128xbf16, #tpu.memory_space<vmem>>, vector<152x128xbf16>
    %cst = arith.constant dense<0.000000e+00> : vector<512x128xf32>
    %2 = tpu.matmul %0, %1, %cst {dimension_numbers = #tpu.dot_dimension_numbers<[1], [0], [0], [1], [0, 0, 1, 1], [], []>} : vector<512x152xbf16>, vector<152x128xbf16>, vector<512x128xf32> -> vector<512x128xf32>
    %c0_3 = arith.constant 0 : index
    %c0_4 = arith.constant 0 : index
    %3 = vector.load %arg4[%c0_3, %c0_4] : memref<1x128xf32, #tpu.memory_space<vmem>>, vector<1x128xf32>
    %4 = vector.broadcast %3 : vector<1x128xf32> to vector<512x128xf32>
    %5 = arith.mulf %2, %4 : vector<512x128xf32>
    %c0_5 = arith.constant 0 : index
    %c0_6 = arith.constant 0 : index
    %6 = vector.load %arg5[%c0_5, %c0_6] : memref<1x128xf32, #tpu.memory_space<vmem>>, vector<1x128xf32>
    %7 = vector.broadcast %6 : vector<1x128xf32> to vector<512x128xf32>
    %8 = arith.addf %5, %7 : vector<512x128xf32>
    %cst_7 = arith.constant 0.000000e+00 : f32
    %9 = vector.broadcast %cst_7 : f32 to vector<512x128xf32>
    %10 = arith.maximumf %8, %9 : vector<512x128xf32>
    %11 = arith.truncf %10 : vector<512x128xf32> to vector<512x128xbf16>
    %c0_8 = arith.constant 0 : index
    %c0_9 = arith.constant 0 : index
    %12 = vector.load %arg6[%c0_8, %c0_9] : memref<512x128xbf16, #tpu.memory_space<vmem>>, vector<512x128xbf16>
    tpu.vector_store %arg6[%c0_8, %c0_9], %11 {strides = array<i32>} : memref<512x128xbf16, #tpu.memory_space<vmem>>, vector<512x128xbf16>,
    return
  }
  func.func @transform_0(%arg0: i32, %arg1: i32) -> (i32, i32) {
    %c0_i32 = arith.constant 0 : i32
    %c0_i32_0 = arith.constant 0 : i32
    return %arg0, %c0_i32 : i32, i32
  }
  func.func @transform_1(%arg0: i32, %arg1: i32) -> (i32, i32) {
    %c0_i32 = arith.constant 0 : i32
    %c0_i32_0 = arith.constant 0 : i32
    return %c0_i32, %arg1 : i32, i32
  }
  func.func @transform_2(%arg0: i32, %arg1: i32) -> (i32, i32) {
    %c0_i32 = arith.constant 0 : i32
    %c0_i32_0 = arith.constant 0 : i32
    return %c0_i32, %arg1 : i32, i32
  }
  func.func @transform_3(%arg0: i32, %arg1: i32) -> (i32, i32) {
    %c0_i32 = arith.constant 0 : i32
    %c0_i32_0 = arith.constant 0 : i32
    return %c0_i32, %arg1 : i32, i32
  }
  func.func @transform_4(%arg0: i32, %arg1: i32) -> (i32, i32) {
    %c0_i32 = arith.constant 0 : i32
    return %arg0, %arg1 : i32, i32
  }
}

</mosaic_0001>

<bundles_post_ra>
// kernel: conv2d_bn_act.1
= control target key start
LH: loop header
LB: loop body
LE: loop exit
PB: predicated region body
PF: predicated region fallthrough
CT: control target
= control target key end

     0   :  { %vm544_vm0 = vcmask 1043456   ;;  %s2534_s0 = inlined_call_operand.vmem [shape: bf16[512,152], index: 0, kind: input, shape index: {}]   ;;  %s2535_s1 = inlined_call_operand.vmem [shape: bf16[152,128], index: 1, kind: input, shape index: {}]   ;;  %s2536_s2 = inlined_call_operand.vmem [shape: f32[1,128], index: 2, kind: input, shape index: {}]   ;;  %s2537_s3 = inlined_call_operand.vmem [shape: f32[1,128], index: 3, kind: input, shape index: {}]   ;;  %s2538_s4 = inlined_call_operand.hbm [shape: bf16[512,128], index: 4, kind: output, shape index: {}]  }
   0x1   :  { %v1627_v0 = vld [vmem:[%s2535_s1 + $0x38] sm:$0xff]  ;;  %v101_v1 = vld [vmem:[%s2535_s1 + $0x48] sm:$0xf]  ;;  %v1626_v3 = vld [vmem:[%s2535_s1 + $0x30] sm:$0xff] }
   0x2   :  { %v427_v2 = vunpack.c.l.b16 %v101_v1  ;;  %548 = vmatpush.bf16.msra.mxu0 %v1627_v0  ;;  %1820 = vmatpush.bf16.msra.mxu2 %v1627_v0  ;;  %v1628_v6 = vld [vmem:[%s2535_s1 + $0x40] sm:$0xff]  ;;  %v1625_v7 = vld [vmem:[%s2535_s1 + $0x28] sm:$0xff]  ;;  %v1590_v10 = vld [vmem:[%s2534_s0 + $0x114] sm:$0xf] }
   0x3   :  { %v1556_v8 = vld [vmem:[%s2534_s0 + $0x4] sm:$0xf]  ;;  %v1236_v9 = vld [vmem:[%s2534_s0 + $0x8] sm:$0xf0]  ;;  %v1372_v11 = vld [vmem:[%s2534_s0 + $0x118] sm:$0xf0] }
   0x4   :  { %v437_v4 = vpack.c.b16 %v427_v2, %v427_v2 }
   0x6   :  { %v546_v5 = vsel %vm544_vm0, %v437_v4, 0  ;;  %549 = vmatpush.bf16.msra.mxu0 %v1626_v3  ;;  %1821 = vmatpush.bf16.msra.mxu2 %v1626_v3 }
   0x7   :  { %723 = vmatpush.bf16.msra.mxu1 %v546_v5  ;;  %1828 = vmatpush.bf16.msra.mxu3 %v546_v5 }
   0x8   :  { %9 = vsyncpa [#allocation3], 0  ;;  %v1239_v12 = vor.u32 %v1556_v8, %v1236_v9  ;;  %vm447_vm1 = vcmask 195584   ;;  %v1624_v13 = vld [vmem:[%s2535_s1 + $0x20] sm:$0xff]  ;;  %v1375_v14 = vor.u32 %v1590_v10, %v1372_v11  ;;  %v1623_v15 = vld [vmem:[%s2535_s1 + $0x18] sm:$0xff]  ;;  %s1220_s5 = sshll.u32 %s2538_s4, 4  ;;  %s1221_s5 = int_to_ptr.hbm [resolvable:$true] %s1220_s5 }
   0x9   :  { %v1622_v16 = vld [vmem:[%s2535_s1 + $0x10] sm:$0xff]  ;;  %v1621_v17 = vld [vmem:[%s2535_s1 + $0x8] sm:$0xff]  ;;  %v1244_v19 = vld [vmem:[%s2534_s0 + $0x18] sm:$0xf0]  ;;  %s1864_s6 = smov 64  }
   0xa   :  { %550 = vmatpush.bf16.msra.mxu0 %v1625_v7  ;;  %1822 = vmatpush.bf16.msra.mxu2 %v1625_v7  ;;  %v1558_v18 = vld [vmem:[%s2534_s0 + $0x14] sm:$0xf]  ;;  %v1592_v20 = vld [vmem:[%s2534_s0 + $0x124] sm:$0xf]  ;;  %v1380_v21 = vld [vmem:[%s2534_s0 + $0x128] sm:$0xf0] }
   0xb   :  { %724 = vmatpush.bf16.msra.mxu1 %v1628_v6  ;;  %1829 = vmatpush.bf16.msra.mxu3 %v1628_v6  ;;  %v1247_v22 = vor.u32 %v1558_v18, %v1244_v19  ;;  %v1620_v23 = vld [vmem:[%s2535_s1] sm:$0xff]  ;;  %v1557_v25 = vld [vmem:[%s2534_s0 + $0x4] sm:$0xf0]  ;;  %v1383_v26 = vor.u32 %v1592_v20, %v1380_v21  ;;  %v1252_v32 = vld [vmem:[%s2534_s0 + $0x28] sm:$0xf0]  ;;  %s1865_s1 = smov 4  }
   0xc   :  { %v1234_v24 = vld [vmem:[%s2534_s0] sm:$0xf]  ;;  %v1589_v28 = vld [vmem:[%s2534_s0 + $0x104] sm:$0xf0]  ;;  %v1560_v31 = vld [vmem:[%s2534_s0 + $0x24] sm:$0xf] }
   0xd   :  { %v1362_v27 = vld [vmem:[%s2534_s0 + $0x100] sm:$0xf]  ;;  %v1235_v29 = vor.u32 %v1557_v25, %v1234_v24  ;;  %v1594_v33 = vld [vmem:[%s2534_s0 + $0x134] sm:$0xf]  ;;  %v1388_v34 = vld [vmem:[%s2534_s0 + $0x138] sm:$0xf0]  ;;  %v1255_v35 = vor.u32 %v1560_v31, %v1252_v32 }
   0xe   :  { %1524 = vmatmul.msk.bf16.vlgmr.msra.gmra.mxu1 %vm447_vm1, %v1239_v12  ;;  %551 = vmatpush.bf16.msra.mxu0 %v1624_v13  ;;  %v1363_v30 = vor.u32 %v1589_v28, %v1362_v27  ;;  %v1242_v36 = vld [vmem:[%s2534_s0 + $0x10] sm:$0xf]  ;;  %v1559_v37 = vld [vmem:[%s2534_s0 + $0x14] sm:$0xf0]  ;;  %v1391_v38 = vor.u32 %v1594_v33, %v1388_v34  ;;  %v1562_v43 = vld [vmem:[%s2534_s0 + $0x34] sm:$0xf] }
   0xf   :  { %1541 = vmatmul.msk.bf16.vlgmr.msra.gmra.mxu3 %vm447_vm1, %v1375_v14  ;;  %1823 = vmatpush.bf16.msra.mxu2 %v1624_v13  ;;  %v1370_v39 = vld [vmem:[%s2534_s0 + $0x110] sm:$0xf]  ;;  %v1591_v40 = vld [vmem:[%s2534_s0 + $0x114] sm:$0xf0]  ;;  %v1243_v41 = vor.u32 %v1559_v37, %v1242_v36  ;;  %v1260_v44 = vld [vmem:[%s2534_s0 + $0x38] sm:$0xf0] }
  0x10   :  { %v1371_v42 = vor.u32 %v1591_v40, %v1370_v39  ;;  %v1596_v45 = vld [vmem:[%s2534_s0 + $0x144] sm:$0xf]  ;;  %v1396_v46 = vld [vmem:[%s2534_s0 + $0x148] sm:$0xf0]  ;;  %v1263_v47 = vor.u32 %v1562_v43, %v1260_v44  ;;  %v1250_v48 = vld [vmem:[%s2534_s0 + $0x20] sm:$0xf] }
  0x11   :  { %v1561_v49 = vld [vmem:[%s2534_s0 + $0x24] sm:$0xf0]  ;;  %v1399_v50 = vor.u32 %v1596_v45, %v1396_v46  ;;  %v1378_v51 = vld [vmem:[%s2534_s0 + $0x120] sm:$0xf]  ;;  %v1564_v55 = vld [vmem:[%s2534_s0 + $0x44] sm:$0xf] }
  0x12   :  { %552 = vmatpush.bf16.msra.mxu0 %v1623_v15  ;;  %v1593_v52 = vld [vmem:[%s2534_s0 + $0x124] sm:$0xf0]  ;;  %v1251_v53 = vor.u32 %v1561_v49, %v1250_v48  ;;  %v1268_v56 = vld [vmem:[%s2534_s0 + $0x48] sm:$0xf0]  ;;  %v1598_v57 = vld [vmem:[%s2534_s0 + $0x154] sm:$0xf] }
  0x13   :  { %1824 = vmatpush.bf16.msra.mxu2 %v1623_v15  ;;  %v1379_v54 = vor.u32 %v1593_v52, %v1378_v51  ;;  %v1404_v58 = vld [vmem:[%s2534_s0 + $0x158] sm:$0xf0]  ;;  %v1271_v59 = vor.u32 %v1564_v55, %v1268_v56  ;;  %v1258_v60 = vld [vmem:[%s2534_s0 + $0x30] sm:$0xf]  ;;  %v1563_v61 = vld [vmem:[%s2534_s0 + $0x34] sm:$0xf0] }
  0x14   :  { %v1407_v62 = vor.u32 %v1598_v57, %v1404_v58  ;;  %v1386_v63 = vld [vmem:[%s2534_s0 + $0x130] sm:$0xf]  ;;  %v1595_v0 = vld [vmem:[%s2534_s0 + $0x134] sm:$0xf0]  ;;  %v1259_v1 = vor.u32 %v1563_v61, %v1258_v60  ;;  %v1566_v3 = vld [vmem:[%s2534_s0 + $0x54] sm:$0xf] }
  0x15   :  { %v1387_v2 = vor.u32 %v1595_v0, %v1386_v63  ;;  %v1276_v4 = vld [vmem:[%s2534_s0 + $0x58] sm:$0xf0]  ;;  %v1600_v5 = vld [vmem:[%s2534_s0 + $0x164] sm:$0xf]  ;;  %v1412_v6 = vld [vmem:[%s2534_s0 + $0x168] sm:$0xf0] }
  0x16   :  { %553 = vmatpush.bf16.msra.mxu0 %v1622_v16  ;;  %v1279_v7 = vor.u32 %v1566_v3, %v1276_v4  ;;  %v1266_v8 = vld [vmem:[%s2534_s0 + $0x40] sm:$0xf]  ;;  %v1565_v9 = vld [vmem:[%s2534_s0 + $0x44] sm:$0xf0]  ;;  %v1415_v10 = vor.u32 %v1600_v5, %v1412_v6  ;;  %v1568_v15 = vld [vmem:[%s2534_s0 + $0x64] sm:$0xf] }
  0x17   :  { %1825 = vmatpush.bf16.msra.mxu2 %v1622_v16  ;;  %v1394_v11 = vld [vmem:[%s2534_s0 + $0x140] sm:$0xf]  ;;  %v1597_v12 = vld [vmem:[%s2534_s0 + $0x144] sm:$0xf0]  ;;  %v1267_v13 = vor.u32 %v1565_v9, %v1266_v8  ;;  %v1284_v16 = vld [vmem:[%s2534_s0 + $0x68] sm:$0xf0] }
  0x18   :  { %v1395_v14 = vor.u32 %v1597_v12, %v1394_v11  ;;  %v1420_v18 = vld [vmem:[%s2534_s0 + $0x178] sm:$0xf0]  ;;  %v1287_v19 = vor.u32 %v1568_v15, %v1284_v16  ;;  %v1274_v20 = vld [vmem:[%s2534_s0 + $0x50] sm:$0xf]  ;;  %v1567_v21 = vld [vmem:[%s2534_s0 + $0x54] sm:$0xf0] }
  0x19   :  { %v1599_v24 = vld [vmem:[%s2534_s0 + $0x154] sm:$0xf0]  ;;  %v1275_v25 = vor.u32 %v1567_v21, %v1274_v20  ;;  %v1570_v27 = vld [vmem:[%s2534_s0 + $0x74] sm:$0xf]  ;;  %v1292_v28 = vld [vmem:[%s2534_s0 + $0x78] sm:$0xf0] }
  0x1a   :  { %554 = vmatpush.bf16.msra.mxu0 %v1621_v17  ;;  %v1295_v31 = vor.u32 %v1570_v27, %v1292_v28  ;;  %v1282_v32 = vld [vmem:[%s2534_s0 + $0x60] sm:$0xf]  ;;  %v1569_v33 = vld [vmem:[%s2534_s0 + $0x64] sm:$0xf0]  ;;  %v1572_v39 = vld [vmem:[%s2534_s0 + $0x84] sm:$0xf] }
  0x1b   :  { %1826 = vmatpush.bf16.msra.mxu2 %v1621_v17  ;;  %v1602_v17 = vld [vmem:[%s2534_s0 + $0x174] sm:$0xf]  ;;  %v1601_v36 = vld [vmem:[%s2534_s0 + $0x164] sm:$0xf0]  ;;  %v1283_v37 = vor.u32 %v1569_v33, %v1282_v32  ;;  %v1300_v40 = vld [vmem:[%s2534_s0 + $0x88] sm:$0xf0] }
  0x1c   :  { %v1303_v43 = vor.u32 %v1572_v39, %v1300_v40  ;;  %v1290_v45 = vld [vmem:[%s2534_s0 + $0x70] sm:$0xf]  ;;  %v1571_v46 = vld [vmem:[%s2534_s0 + $0x74] sm:$0xf0]  ;;  %v1308_v55 = vld [vmem:[%s2534_s0 + $0x98] sm:$0xf0] }
  0x1d   :  { %v1418_v48 = vld [vmem:[%s2534_s0 + $0x170] sm:$0xf]  ;;  %v1603_v49 = vld [vmem:[%s2534_s0 + $0x174] sm:$0xf0]  ;;  %v1608_v56 = vld [vmem:[%s2534_s0 + $0x1a4] sm:$0xf] }
  0x1e   :  { %1525 = vmatmul.msk.bf16.gmra.mxu1 %vm447_vm1, %v1247_v22  ;;  %555 = vmatpush.bf16.msra.mxu0 %v1620_v23  ;;  %v1423_v22 = vor.u32 %v1602_v17, %v1420_v18  ;;  %v1419_v51 = vor.u32 %v1603_v49, %v1418_v48  ;;  %v1444_v57 = vld [vmem:[%s2534_s0 + $0x1a8] sm:$0xf0]  ;;  %v1298_v61 = vld [vmem:[%s2534_s0 + $0x80] sm:$0xf]  ;;  %v1610_v16 = vld [vmem:[%s2534_s0 + $0x1b4] sm:$0xf] }
  0x1f   :  { %1542 = vmatmul.msk.bf16.gmra.mxu3 %vm447_vm1, %v1383_v26  ;;  %1827 = vmatpush.bf16.msra.mxu2 %v1620_v23  ;;  %v1402_v23 = vld [vmem:[%s2534_s0 + $0x150] sm:$0xf]  ;;  %v1447_v63 = vor.u32 %v1608_v56, %v1444_v57  ;;  %v1426_v0 = vld [vmem:[%s2534_s0 + $0x180] sm:$0xf]  ;;  %v1452_v17 = vld [vmem:[%s2534_s0 + $0x1b8] sm:$0xf0] }
  0x20   :  { %v1403_v26 = vor.u32 %v1599_v24, %v1402_v23  ;;  %v2176_v6 = vld [vmem:[%s2536_s2] ss:$0 sm:$0xff]  ;;  %v1306_v23 = vld [vmem:[%s2534_s0 + $0x90] sm:$0xf]  ;;  %v1575_v24 = vld [vmem:[%s2534_s0 + $0x94] sm:$0xf0] }
  0x21   :  { %556 = vmatmul.bf16.vlgmr.msra.gmra.mxu0 %v1235_v29  ;;  %v1604_v29 = vld [vmem:[%s2534_s0 + $0x184] sm:$0xf]  ;;  %v1434_v27 = vld [vmem:[%s2534_s0 + $0x190] sm:$0xf]  ;;  %v1607_v28 = vld [vmem:[%s2534_s0 + $0x194] sm:$0xf0]  ;;  %v1307_v32 = vor.u32 %v1575_v24, %v1306_v23 }
  0x22   :  { %636 = vmatmul.bf16.vlgmr.msra.gmra.mxu2 %v1363_v30  ;;  %v1428_v30 = vld [vmem:[%s2534_s0 + $0x188] sm:$0xf0]  ;;  %v1442_v57 = vld [vmem:[%s2534_s0 + $0x1a0] sm:$0xf]  ;;  %v1614_v24 = vld [vmem:[%s2534_s0 + $0x1d4] sm:$0xf] }
  0x23   :  { %v1431_v34 = vor.u32 %v1604_v29, %v1428_v30 }
  0x2e   :  { %1526 = vmatmul.msk.bf16.gmra.mxu1 %vm447_vm1, %v1255_v35  ;;  %v1410_v35 = vld [vmem:[%s2534_s0 + $0x160] sm:$0xf] }
  0x2f   :  { %1543 = vmatmul.msk.bf16.gmra.mxu3 %vm447_vm1, %v1391_v38  ;;  %v1411_v38 = vor.u32 %v1601_v36, %v1410_v35 }
  0x31   :  { %561 = vmatmul.bf16.gmra.mxu0 %v1243_v41  ;;  %v1606_v41 = vld [vmem:[%s2534_s0 + $0x194] sm:$0xf] }
  0x32   :  { %641 = vmatmul.bf16.gmra.mxu2 %v1371_v42  ;;  %v1436_v42 = vld [vmem:[%s2534_s0 + $0x198] sm:$0xf0] }
  0x3e   :  { %1527 = vmatmul.msk.bf16.gmra.mxu1 %vm447_vm1, %v1263_v47  ;;  %v1439_v47 = vor.u32 %v1606_v41, %v1436_v42  ;;  %v1578_v42 = vld [vmem:[%s2534_s0 + $0xb4] sm:$0xf] }
  0x3f   :  { %1544 = vmatmul.msk.bf16.gmra.mxu3 %vm447_vm1, %v1399_v50  ;;  %v1291_v50 = vor.u32 %v1571_v46, %v1290_v45  ;;  %v1612_v45 = vld [vmem:[%s2534_s0 + $0x1c4] sm:$0xf]  ;;  %v1460_v46 = vld [vmem:[%s2534_s0 + $0x1c8] sm:$0xf0] }
  0x40   :  { %v1463_v56 = vor.u32 %v1612_v45, %v1460_v46 }
  0x41   :  { %566 = vmatmul.bf16.gmra.mxu0 %v1251_v53 }
  0x42   :  { %646 = vmatmul.bf16.gmra.mxu2 %v1379_v54  ;;  %v1574_v54 = vld [vmem:[%s2534_s0 + $0x94] sm:$0xf] }
  0x43   :  { %v1311_v58 = vor.u32 %v1574_v54, %v1308_v55  ;;  %v1314_v54 = vld [vmem:[%s2534_s0 + $0xa0] sm:$0xf]  ;;  %v1577_v55 = vld [vmem:[%s2534_s0 + $0xa4] sm:$0xf0] }
  0x4e   :  { %1528 = vmatmul.msk.bf16.gmra.mxu1 %vm447_vm1, %v1271_v59 }
  0x4f   :  { %1545 = vmatmul.msk.bf16.gmra.mxu3 %vm447_vm1, %v1407_v62  ;;  %v1573_v62 = vld [vmem:[%s2534_s0 + $0x84] sm:$0xf0] }
  0x51   :  { %571 = vmatmul.bf16.gmra.mxu0 %v1259_v1  ;;  %v1605_v1 = vld [vmem:[%s2534_s0 + $0x184] sm:$0xf0] }
  0x52   :  { %651 = vmatmul.bf16.gmra.mxu2 %v1387_v2  ;;  %v1299_v2 = vor.u32 %v1573_v62, %v1298_v61  ;;  %v1427_v4 = vor.u32 %v1605_v1, %v1426_v0  ;;  %v1315_v0 = vor.u32 %v1577_v55, %v1314_v54 }
  0x5e   :  { %1529 = vmatmul.msk.bf16.gmra.mxu1 %vm447_vm1, %v1279_v7 }
  0x5f   :  { %1546 = vmatmul.msk.bf16.gmra.mxu3 %vm447_vm1, %v1415_v10  ;;  %v2184_v10 = vld [vmem:[%s2537_s3] ss:$0 sm:$0xff] }
  0x61   :  { %576 = vmatmul.bf16.gmra.mxu0 %v1267_v13  ;;  %v1576_v13 = vld [vmem:[%s2534_s0 + $0xa4] sm:$0xf] }
  0x62   :  { %656 = vmatmul.bf16.gmra.mxu2 %v1395_v14  ;;  %v1316_v14 = vld [vmem:[%s2534_s0 + $0xa8] sm:$0xf0] }
  0x63   :  { %v1319_v20 = vor.u32 %v1576_v13, %v1316_v14 }
  0x6e   :  { %1530 = vmatmul.msk.bf16.gmra.mxu1 %vm447_vm1, %v1287_v19 }
  0x6f   :  { %1547 = vmatmul.msk.bf16.gmra.mxu3 %vm447_vm1, %v1423_v22 }
  0x71   :  { %581 = vmatmul.bf16.gmra.mxu0 %v1275_v25  ;;  %v1455_v25 = vor.u32 %v1610_v16, %v1452_v17 }
  0x72   :  { %661 = vmatmul.bf16.gmra.mxu2 %v1403_v26 }
  0x7e   :  { %1531 = vmatmul.msk.bf16.gmra.mxu1 %vm447_vm1, %v1295_v31 }
  0x7f   :  { %1548 = vmatmul.msk.bf16.gmra.mxu3 %vm447_vm1, %v1431_v34  ;;  %v1435_v34 = vor.u32 %v1607_v28, %v1434_v27 }
  0x81   :  { %586 = vmatmul.bf16.gmra.mxu0 %v1283_v37 }
  0x82   :  { %666 = vmatmul.bf16.gmra.mxu2 %v1411_v38 }
  0x8b   :  { %v726_v44 = vpop.f32.mrf.mxu1 }
  0x8e   :  { %1532 = vmatmul.msk.bf16.gmra.mxu1 %vm447_vm1, %v1303_v43  ;;  %v1324_v43 = vld [vmem:[%s2534_s0 + $0xb8] sm:$0xf0] }
  0x8f   :  { %1549 = vmatmul.msk.bf16.gmra.mxu3 %vm447_vm1, %v1439_v47 }
  0x91   :  { %591 = vmatmul.bf16.gmra.mxu0 %v1291_v50  ;;  %v1327_v50 = vor.u32 %v1578_v42, %v1324_v43 }
  0x92   :  { %v2143_v52 = vpop.f32.mrf.mxu3  ;;  %671 = vmatmul.bf16.gmra.mxu2 %v1419_v51 }
  0x93   :  { %v728_v53 = vpop.f32.mrf.mxu1 }
  0x9a   :  { %v2157_v59 = vpop.f32.mrf.mxu3 }
  0x9b   :  { %v731_v60 = vpop.f32.mrf.mxu1 }
  0x9e   :  { %1533 = vmatmul.msk.bf16.gmra.mxu1 %vm447_vm1, %v1311_v58  ;;  %v557_v3 = vpop.f32.mrf.mxu0  ;;  %v1609_v58 = vld [vmem:[%s2534_s0 + $0x1a4] sm:$0xf0] }
  0x9f   :  { %1550 = vmatmul.msk.bf16.gmra.mxu3 %vm447_vm1, %v1447_v63  ;;  %v727_v5 = vadd.f32 %v726_v44, %v557_v3  ;;  %v1443_v3 = vor.u32 %v1609_v58, %v1442_v57 }
  0xa1   :  { %596 = vmatmul.bf16.gmra.mxu0 %v1299_v2  ;;  %v890_v9 = vmul.f32 %v2176_v6, %v727_v5 }
  0xa2   :  { %v2178_v7 = vpop.f32.mrf.mxu3  ;;  %676 = vmatmul.bf16.gmra.mxu2 %v1427_v4 }
  0xa3   :  { %v733_v8 = vpop.f32.mrf.mxu1  ;;  %v958_v18 = vadd.f32 %v2184_v10, %v890_v9 }
  0xa5   :  { %v2186_v11 = vpop.f32.mrf.mxu2  ;;  %v1022_v29 = vmax.f32 %v958_v18, 0.0 }
  0xa6   :  { %v559_v12 = vpop.f32.mrf.mxu0 }
  0xa7   :  { %v729_v15 = vadd.f32 %v728_v53, %v559_v12 }
  0xa9   :  { %v891_v19 = vmul.f32 %v2176_v6, %v729_v15 }
  0xaa   :  { %v2202_v21 = vpop.f32.mrf.mxu3 }
  0xab   :  { %v736_v22 = vpop.f32.mrf.mxu1  ;;  %v959_v26 = vadd.f32 %v2184_v10, %v891_v19 }
  0xad   :  { %v1023_v30 = vmax.f32 %v959_v26, 0.0  ;;  %v2217_v31 = vpop.f32.mrf.mxu2 }
  0xae   :  { %1534 = vmatmul.msk.bf16.gmra.mxu1 %vm447_vm1, %v1319_v20  ;;  %v562_v33 = vpop.f32.mrf.mxu0  ;;  %v1580_v20 = vld [vmem:[%s2534_s0 + $0xc4] sm:$0xf] }
  0xaf   :  { %1551 = vmatmul.msk.bf16.gmra.mxu3 %vm447_vm1, %v1455_v25  ;;  %v1632_v35 = vpack.c.bf16 %v1023_v30, %v1022_v29  ;;  %v732_v36 = vadd.f32 %v731_v60, %v562_v33  ;;  %v1468_v25 = vld [vmem:[%s2534_s0 + $0x1d8] sm:$0xf0]  ;;  %v1322_v33 = vld [vmem:[%s2534_s0 + $0xb0] sm:$0xf] }
  0xb1   :  { %1633 = vst [vmem:[#allocation2] sm:$0xff] %v1632_v35   ;;  %601 = vmatmul.bf16.gmra.mxu0 %v1307_v32  ;;  %v892_v39 = vmul.f32 %v2176_v6, %v732_v36  ;;  %v1471_v35 = vor.u32 %v1614_v24, %v1468_v25  ;;  %v1450_v36 = vld [vmem:[%s2534_s0 + $0x1b0] sm:$0xf] }
  0xb2   :  { %v2221_v37 = vpop.f32.mrf.mxu3  ;;  %681 = vmatmul.bf16.gmra.mxu2 %v1435_v34  ;;  %v1579_v34 = vld [vmem:[%s2534_s0 + $0xb4] sm:$0xf0] }
  0xb3   :  { %v738_v38 = vpop.f32.mrf.mxu1  ;;  %v960_v48 = vadd.f32 %v2184_v10, %v892_v39  ;;  %v1323_v43 = vor.u32 %v1579_v34, %v1322_v33 }
  0xb5   :  { %v642_v40 = vpop.f32.mrf.mxu2  ;;  %v1024_v61 = vmax.f32 %v960_v48, 0.0 }
  0xb6   :  { %v564_v41 = vpop.f32.mrf.mxu0  ;;  %v812_v47 = vadd.f32 %v2143_v52, %v642_v40 }
  0xb7   :  { %v734_v44 = vadd.f32 %v733_v8, %v564_v41 }
  0xb8   :  { %v924_v60 = vmul.f32 %v2176_v6, %v812_v47 }
  0xb9   :  { %v893_v49 = vmul.f32 %v2176_v6, %v734_v44 }
  0xba   :  { %v2239_v51 = vpop.f32.mrf.mxu3  ;;  %v992_v5 = vadd.f32 %v2184_v10, %v924_v60 }
  0xbb   :  { %v2241_v53 = vpop.f32.mrf.mxu1  ;;  %v961_v52 = vadd.f32 %v2184_v10, %v893_v49 }
  0xbc   :  { %v1056_v15 = vmax.f32 %v992_v5, 0.0 }
  0xbd   :  { %v1025_v62 = vmax.f32 %v961_v52, 0.0  ;;  %v644_v63 = vpop.f32.mrf.mxu2 }
  0xbe   :  { %1535 = vmatmul.msk.bf16.gmra.mxu1 %vm447_vm1, %v1327_v50  ;;  %v814_v1 = vadd.f32 %v2157_v59, %v644_v63  ;;  %v567_v2 = vpop.f32.mrf.mxu0 }
  0xbf   :  { %1552 = vmatmul.msk.bf16.gmra.mxu3 %vm447_vm1, %v1463_v56  ;;  %v1637_v4 = vpack.c.bf16 %v1025_v62, %v1024_v61  ;;  %v737_v9 = vadd.f32 %v736_v22, %v567_v2  ;;  %v1332_v22 = vld [vmem:[%s2534_s0 + $0xc8] sm:$0xf0]  ;;  %v1582_v62 = vld [vmem:[%s2534_s0 + $0xd4] sm:$0xf] }
  0xc0   :  { %v925_v8 = vmul.f32 %v2176_v6, %v814_v1  ;;  %v1335_v29 = vor.u32 %v1580_v20, %v1332_v22  ;;  %v1476_v1 = vld [vmem:[%s2534_s0 + $0x1e8] sm:$0xf0] }
  0xc1   :  { %1789 = vst [vmem:[#allocation2 + $0x8] sm:$0xff] %v1637_v4   ;;  %606 = vmatmul.bf16.gmra.mxu0 %v1315_v0  ;;  %v894_v16 = vmul.f32 %v2176_v6, %v737_v9  ;;  %v1616_v0 = vld [vmem:[%s2534_s0 + $0x1e4] sm:$0xf] }
  0xc2   :  { %v2262_v12 = vpop.f32.mrf.mxu3  ;;  %v993_v13 = vadd.f32 %v2184_v10, %v925_v8  ;;  %686 = vmatmul.bf16.gmra.mxu2 %v1443_v3 }
  0xc3   :  { %v743_v14 = vpop.f32.mrf.mxu1  ;;  %v962_v27 = vadd.f32 %v2184_v10, %v894_v16  ;;  %v1613_v16 = vld [vmem:[%s2534_s0 + $0x1c4] sm:$0xf0] }
  0xc4   :  { %v1057_v59 = vmax.f32 %v993_v13, 0.0  ;;  %v1330_v13 = vld [vmem:[%s2534_s0 + $0xc0] sm:$0xf] }
  0xc5   :  { %v647_v17 = vpop.f32.mrf.mxu2  ;;  %v1026_v40 = vmax.f32 %v962_v27, 0.0 }
  0xc6   :  { %v1717_v18 = vpack.c.bf16 %v1057_v59, %v1056_v15  ;;  %v569_v19 = vpop.f32.mrf.mxu0  ;;  %v817_v26 = vadd.f32 %v2178_v7, %v647_v17  ;;  %v1479_v15 = vor.u32 %v1616_v0, %v1476_v1  ;;  %v1458_v59 = vld [vmem:[%s2534_s0 + $0x1c0] sm:$0xf] }
  0xc7   :  { %v739_v23 = vadd.f32 %v738_v38, %v569_v19  ;;  %v1611_v38 = vld [vmem:[%s2534_s0 + $0x1b4] sm:$0xf0]  ;;  %v1459_v25 = vor.u32 %v1613_v16, %v1458_v59 }
  0xc8   :  { %1805 = vst [vmem:[#allocation2 + $0x88] sm:$0xff] %v1717_v18   ;;  %v926_v39 = vmul.f32 %v2176_v6, %v817_v26  ;;  %v1451_v46 = vor.u32 %v1611_v38, %v1450_v36 }
  0xc9   :  { %v895_v28 = vmul.f32 %v2176_v6, %v739_v23 }
  0xca   :  { %v2281_v30 = vpop.f32.mrf.mxu3  ;;  %v994_v48 = vadd.f32 %v2184_v10, %v926_v39 }
  0xcb   :  { %v2283_v32 = vpop.f32.mrf.mxu1  ;;  %v963_v7 = vadd.f32 %v2184_v10, %v895_v28 }
  0xcd   :  { %v1027_v41 = vmax.f32 %v963_v7, 0.0  ;;  %v649_v42 = vpop.f32.mrf.mxu2 }
  0xce   :  { %1536 = vmatmul.msk.bf16.gmra.mxu1 %vm447_vm1, %v1335_v29  ;;  %v819_v44 = vadd.f32 %v2202_v21, %v649_v42  ;;  %v572_v45 = vpop.f32.mrf.mxu0  ;;  %v1058_v21 = vmax.f32 %v994_v48, 0.0 }
  0xcf   :  { %1553 = vmatmul.msk.bf16.gmra.mxu3 %vm447_vm1, %v1471_v35  ;;  %v1642_v47 = vpack.c.bf16 %v1027_v41, %v1026_v40  ;;  %v742_v50 = vadd.f32 %v2241_v53, %v572_v45  ;;  %v1340_v53 = vld [vmem:[%s2534_s0 + $0xd8] sm:$0xf0]  ;;  %v1584_v41 = vld [vmem:[%s2534_s0 + $0xe4] sm:$0xf] }
  0xd0   :  { %v927_v49 = vmul.f32 %v2176_v6, %v819_v44  ;;  %v1343_v5 = vor.u32 %v1582_v62, %v1340_v53  ;;  %v1484_v44 = vld [vmem:[%s2534_s0 + $0x1f8] sm:$0xf0] }
  0xd1   :  { %1790 = vst [vmem:[#allocation2 + $0x10] sm:$0xff] %v1642_v47   ;;  %611 = vmatmul.bf16.gmra.mxu0 %v1323_v43  ;;  %v896_v57 = vmul.f32 %v2176_v6, %v742_v50  ;;  %v1618_v43 = vld [vmem:[%s2534_s0 + $0x1f4] sm:$0xf] }
  0xd2   :  { %v2305_v54 = vpop.f32.mrf.mxu3  ;;  %v995_v55 = vadd.f32 %v2184_v10, %v927_v49  ;;  %691 = vmatmul.bf16.gmra.mxu2 %v1451_v46 }
  0xd3   :  { %v748_v56 = vpop.f32.mrf.mxu1  ;;  %v964_v3 = vadd.f32 %v2184_v10, %v896_v57  ;;  %v1615_v57 = vld [vmem:[%s2534_s0 + $0x1d4] sm:$0xf0] }
  0xd4   :  { %v1059_v52 = vmax.f32 %v995_v55, 0.0  ;;  %v1338_v55 = vld [vmem:[%s2534_s0 + $0xd0] sm:$0xf] }
  0xd5   :  { %v652_v58 = vpop.f32.mrf.mxu2  ;;  %v1028_v18 = vmax.f32 %v964_v3, 0.0 }
  0xd6   :  { %v1722_v60 = vpack.c.bf16 %v1059_v52, %v1058_v21  ;;  %v574_v61 = vpop.f32.mrf.mxu0  ;;  %v822_v2 = vadd.f32 %v2221_v37, %v652_v58  ;;  %v1487_v21 = vor.u32 %v1618_v43, %v1484_v44 }
  0xd7   :  { %v744_v63 = vadd.f32 %v743_v14, %v574_v61  ;;  %v1581_v14 = vld [vmem:[%s2534_s0 + $0xc4] sm:$0xf0] }
  0xd8   :  { %1806 = vst [vmem:[#allocation2 + $0x90] sm:$0xff] %v1722_v60   ;;  %v928_v17 = vmul.f32 %v2176_v6, %v822_v2  ;;  %v1331_v22 = vor.u32 %v1581_v14, %v1330_v13 }
  0xd9   :  { %v897_v4 = vmul.f32 %v2176_v6, %v744_v63 }
  0xda   :  { %v2324_v8 = vpop.f32.mrf.mxu3  ;;  %v996_v27 = vadd.f32 %v2184_v10, %v928_v17 }
  0xdb   :  { %v2326_v9 = vpop.f32.mrf.mxu1  ;;  %v965_v37 = vadd.f32 %v2184_v10, %v897_v4 }
  0xdd   :  { %v1029_v19 = vmax.f32 %v965_v37, 0.0  ;;  %v654_v20 = vpop.f32.mrf.mxu2 }
  0xde   :  { %1537 = vmatmul.msk.bf16.gmra.mxu1 %vm447_vm1, %v1343_v5  ;;  %v824_v23 = vadd.f32 %v2239_v51, %v654_v20  ;;  %v577_v24 = vpop.f32.mrf.mxu0  ;;  %v1060_v51 = vmax.f32 %v996_v27, 0.0  ;;  %v1346_v27 = vld [vmem:[%s2534_s0 + $0xe0] sm:$0xf] }
  0xdf   :  { %1554 = vmatmul.msk.bf16.gmra.mxu3 %vm447_vm1, %v1479_v15  ;;  %v1647_v26 = vpack.c.bf16 %v1029_v19, %v1028_v18  ;;  %v747_v29 = vadd.f32 %v2283_v32, %v577_v24  ;;  %v1348_v32 = vld [vmem:[%s2534_s0 + $0xe8] sm:$0xf0]  ;;  %v1586_v19 = vld [vmem:[%s2534_s0 + $0xf4] sm:$0xf] }
  0xe0   :  { %v929_v28 = vmul.f32 %v2176_v6, %v824_v23  ;;  %v1351_v48 = vor.u32 %v1584_v41, %v1348_v32 }
  0xe1   :  { %1791 = vst [vmem:[#allocation2 + $0x18] sm:$0xff] %v1647_v26   ;;  %616 = vmatmul.bf16.gmra.mxu0 %v1331_v22  ;;  %v898_v36 = vmul.f32 %v2176_v6, %v747_v29 }
  0xe2   :  { %v2348_v33 = vpop.f32.mrf.mxu3  ;;  %v997_v34 = vadd.f32 %v2184_v10, %v929_v28  ;;  %696 = vmatmul.bf16.gmra.mxu2 %v1459_v25  ;;  %v1585_v28 = vld [vmem:[%s2534_s0 + $0xe4] sm:$0xf0] }
  0xe3   :  { %v753_v35 = vpop.f32.mrf.mxu1  ;;  %v966_v46 = vadd.f32 %v2184_v10, %v898_v36 }
  0xe4   :  { %v1061_v7 = vmax.f32 %v997_v34, 0.0  ;;  %v1617_v34 = vld [vmem:[%s2534_s0 + $0x1e4] sm:$0xf0] }
  0xe5   :  { %v657_v38 = vpop.f32.mrf.mxu2  ;;  %v1030_v60 = vmax.f32 %v966_v46, 0.0 }
  0xe6   :  { %v1727_v39 = vpack.c.bf16 %v1061_v7, %v1060_v51  ;;  %v579_v40 = vpop.f32.mrf.mxu0  ;;  %v827_v45 = vadd.f32 %v2262_v12, %v657_v38  ;;  %v1466_v12 = vld [vmem:[%s2534_s0 + $0x1d0] sm:$0xf]  ;;  %v1347_v38 = vor.u32 %v1585_v28, %v1346_v27 }
  0xe7   :  { %v749_v42 = vadd.f32 %v748_v56, %v579_v40  ;;  %v1583_v56 = vld [vmem:[%s2534_s0 + $0xd4] sm:$0xf0]  ;;  %v1467_v1 = vor.u32 %v1615_v57, %v1466_v12  ;;  %v1588_v12 = vld [vmem:[%s2534_s0 + $0x104] sm:$0xf] }
  0xe8   :  { %1807 = vst [vmem:[#allocation2 + $0x98] sm:$0xff] %v1727_v39   ;;  %v930_v58 = vmul.f32 %v2176_v6, %v827_v45  ;;  %v1339_v53 = vor.u32 %v1583_v56, %v1338_v55 }
  0xe9   :  { %v899_v47 = vmul.f32 %v2176_v6, %v749_v42 }
  0xea   :  { %v2367_v49 = vpop.f32.mrf.mxu3  ;;  %v998_v3 = vadd.f32 %v2184_v10, %v930_v58 }
  0xeb   :  { %v756_v50 = vpop.f32.mrf.mxu1  ;;  %v967_v52 = vadd.f32 %v2184_v10, %v899_v47 }
  0xed   :  { %v1031_v61 = vmax.f32 %v967_v52, 0.0  ;;  %v659_v62 = vpop.f32.mrf.mxu2 }
  0xee   :  { %1538 = vmatmul.msk.bf16.gmra.mxu1 %vm447_vm1, %v1351_v48  ;;  %v829_v63 = vadd.f32 %v2281_v30, %v659_v62  ;;  %v582_v0 = vpop.f32.mrf.mxu0  ;;  %v1062_v30 = vmax.f32 %v998_v3, 0.0  ;;  %v1619_v3 = vld [vmem:[%s2534_s0 + $0x1f4] sm:$0xf0] }
  0xef   :  { %1555 = vmatmul.msk.bf16.gmra.mxu3 %vm447_vm1, %v1487_v21  ;;  %v1652_v2 = vpack.c.bf16 %v1031_v61, %v1030_v60  ;;  %v752_v5 = vadd.f32 %v2326_v9, %v582_v0  ;;  %v1356_v9 = vld [vmem:[%s2534_s0 + $0xf8] sm:$0xf0]  ;;  %v1354_v0 = vld [vmem:[%s2534_s0 + $0xf0] sm:$0xf] }
  0xf0   :  { %v931_v4 = vmul.f32 %v2176_v6, %v829_v63  ;;  %v1359_v25 = vor.u32 %v1586_v19, %v1356_v9 }
  0xf1   :  { %1792 = vst [vmem:[#allocation2 + $0x20] sm:$0xff] %v1652_v2   ;;  %621 = vmatmul.bf16.gmra.mxu0 %v1339_v53  ;;  %v900_v59 = vmul.f32 %v2176_v6, %v752_v5 }
  0xf2   :  { %v999_v13 = vadd.f32 %v2184_v10, %v931_v4  ;;  %701 = vmatmul.bf16.gmra.mxu2 %v1467_v1  ;;  %v2390_v15 = vpop.f32.mrf.mxu3  ;;  %v1587_v1 = vld [vmem:[%s2534_s0 + $0xf4] sm:$0xf0] }
  0xf3   :  { %v758_v14 = vpop.f32.mrf.mxu1  ;;  %v968_v23 = vadd.f32 %v2184_v10, %v900_v59 }
  0xf4   :  { %v1063_v37 = vmax.f32 %v999_v13, 0.0 }
  0xf5   :  { %v662_v16 = vpop.f32.mrf.mxu2  ;;  %v1032_v51 = vmax.f32 %v968_v23, 0.0 }
  0xf6   :  { %v1732_v17 = vpack.c.bf16 %v1063_v37, %v1062_v30  ;;  %v584_v18 = vpop.f32.mrf.mxu0  ;;  %v832_v22 = vadd.f32 %v2305_v54, %v662_v16  ;;  %v1474_v54 = vld [vmem:[%s2534_s0 + $0x1e0] sm:$0xf]  ;;  %v1355_v30 = vor.u32 %v1587_v1, %v1354_v0 }
  0xf7   :  { %v754_v20 = vadd.f32 %v753_v35, %v584_v18  ;;  %v1475_v32 = vor.u32 %v1617_v34, %v1474_v54 }
  0xf8   :  { %1808 = vst [vmem:[#allocation2 + $0xa0] sm:$0xff] %v1732_v17   ;;  %v932_v35 = vmul.f32 %v2176_v6, %v832_v22 }
  0xf9   :  { %v901_v24 = vmul.f32 %v2176_v6, %v754_v20 }
  0xfa   :  { %v2417_v39 = vpop.f32.mrf.mxu3  ;;  %v1000_v43 = vadd.f32 %v2184_v10, %v932_v35 }
  0xfb   :  { %v761_v26 = vpop.f32.mrf.mxu1  ;;  %v969_v29 = vadd.f32 %v2184_v10, %v901_v24 }
  0xfc   :  { %v1064_v48 = vmax.f32 %v1000_v43, 0.0 }
  0xfd   :  { %v1033_v7 = vmax.f32 %v969_v29, 0.0  ;;  %v664_v36 = vpop.f32.mrf.mxu2 }
  0xfe   :  { %1539 = vmatmul.msk.bf16.gmra.mxu1 %vm447_vm1, %v1359_v25  ;;  %v834_v40 = vadd.f32 %v2324_v8, %v664_v36  ;;  %v587_v41 = vpop.f32.mrf.mxu0 }
  0xff   :  { %v1657_v42 = vpack.c.bf16 %v1033_v7, %v1032_v51  ;;  %v757_v45 = vadd.f32 %v756_v50, %v587_v41  ;;  %v1364_v50 = vld [vmem:[%s2534_s0 + $0x108] sm:$0xf0] }
 0x100   :  { %v933_v44 = vmul.f32 %v2176_v6, %v834_v40  ;;  %v1367_v53 = vor.u32 %v1588_v12, %v1364_v50 }
 0x101   :  { %1793 = vst [vmem:[#allocation2 + $0x28] sm:$0xff] %v1657_v42   ;;  %626 = vmatmul.bf16.gmra.mxu0 %v1347_v38  ;;  %v902_v56 = vmul.f32 %v2176_v6, %v757_v45 }
 0x102   :  { %v1001_v46 = vadd.f32 %v2184_v10, %v933_v44  ;;  %706 = vmatmul.bf16.gmra.mxu2 %v1475_v32  ;;  %v2430_v58 = vpop.f32.mrf.mxu3 }
 0x103   :  { %v763_v47 = vpop.f32.mrf.mxu1  ;;  %v970_v61 = vadd.f32 %v2184_v10, %v902_v56 }
 0x104   :  { %v1065_v55 = vmax.f32 %v1001_v46, 0.0 }
 0x105   :  { %v667_v21 = vpop.f32.mrf.mxu2  ;;  %v1034_v5 = vmax.f32 %v970_v61, 0.0 }
 0x106   :  { %v1737_v8 = vpack.c.bf16 %v1065_v55, %v1064_v48  ;;  %v589_v52 = vpop.f32.mrf.mxu0  ;;  %v837_v60 = vadd.f32 %v2348_v33, %v667_v21  ;;  %v1482_v33 = vld [vmem:[%s2534_s0 + $0x1f0] sm:$0xf] }
 0x107   :  { %v759_v57 = vadd.f32 %v758_v14, %v589_v52  ;;  %v1483_v16 = vor.u32 %v1619_v3, %v1482_v33 }
 0x108   :  { %1809 = vst [vmem:[#allocation2 + $0xa8] sm:$0xff] %v1737_v8   ;;  %v934_v4 = vmul.f32 %v2176_v6, %v837_v60 }
 0x109   :  { %v903_v62 = vmul.f32 %v2176_v6, %v759_v57 }
 0x10a   :  { %v1002_v18 = vadd.f32 %v2184_v10, %v934_v4  ;;  %v848_v20 = vpop.f32.mrf.mxu3 }
 0x10b   :  { %v766_v63 = vpop.f32.mrf.mxu1  ;;  %v971_v2 = vadd.f32 %v2184_v10, %v903_v62 }
 0x10c   :  { %v1066_v24 = vmax.f32 %v1002_v18, 0.0 }
 0x10d   :  { %v1035_v13 = vmax.f32 %v971_v2, 0.0  ;;  %v669_v14 = vpop.f32.mrf.mxu2 }
 0x10e   :  { %1540 = vmatmul.msk.bf16.gmra.mxu1 %vm447_vm1, %v1367_v53  ;;  %v839_v37 = vadd.f32 %v2367_v49, %v669_v14  ;;  %v592_v59 = vpop.f32.mrf.mxu0 }
 0x10f   :  { %v1662_v17 = vpack.c.bf16 %v1035_v13, %v1034_v5  ;;  %v762_v9 = vadd.f32 %v761_v26, %v592_v59 }
 0x110   :  { %v935_v19 = vmul.f32 %v2176_v6, %v839_v37 }
 0x111   :  { %1794 = vst [vmem:[#allocation2 + $0x30] sm:$0xff] %v1662_v17   ;;  %631 = vmatmul.bf16.gmra.mxu0 %v1355_v30  ;;  %v904_v27 = vmul.f32 %v2176_v6, %v762_v9 }
 0x112   :  { %v1003_v22 = vadd.f32 %v2184_v10, %v935_v19  ;;  %711 = vmatmul.bf16.gmra.mxu2 %v1483_v16  ;;  %v851_v36 = vpop.f32.mrf.mxu3 }
 0x113   :  { %v768_v23 = vpop.f32.mrf.mxu1  ;;  %v972_v35 = vadd.f32 %v2184_v10, %v904_v27 }
 0x114   :  { %v1067_v25 = vmax.f32 %v1003_v22, 0.0 }
 0x115   :  { %v672_v49 = vpop.f32.mrf.mxu2  ;;  %v1036_v40 = vmax.f32 %v972_v35, 0.0 }
 0x116   :  { %v1742_v28 = vpack.c.bf16 %v1067_v25, %v1066_v24  ;;  %v594_v29 = vpop.f32.mrf.mxu0  ;;  %v842_v34 = vadd.f32 %v2390_v15, %v672_v49 }
 0x117   :  { %v764_v54 = vadd.f32 %v763_v47, %v594_v29 }
 0x118   :  { %1810 = vst [vmem:[#allocation2 + $0xb0] sm:$0xff] %v1742_v28   ;;  %v936_v38 = vmul.f32 %v2176_v6, %v842_v34 }
 0x119   :  { %v905_v26 = vmul.f32 %v2176_v6, %v764_v54 }
 0x11a   :  { %v1004_v45 = vadd.f32 %v2184_v10, %v936_v38  ;;  %v853_v52 = vpop.f32.mrf.mxu3 }
 0x11b   :  { %v771_v51 = vpop.f32.mrf.mxu1  ;;  %v973_v7 = vadd.f32 %v2184_v10, %v905_v26 }
 0x11c   :  { %v1068_v55 = vmax.f32 %v1004_v45, 0.0 }
 0x11d   :  { %v1037_v41 = vmax.f32 %v973_v7, 0.0  ;;  %v674_v32 = vpop.f32.mrf.mxu2 }
 0x11e   :  { %v844_v42 = vadd.f32 %v2417_v39, %v674_v32  ;;  %v597_v43 = vpop.f32.mrf.mxu0 }
 0x11f   :  { %v1667_v44 = vpack.c.bf16 %v1037_v41, %v1036_v40  ;;  %v767_v46 = vadd.f32 %v766_v63, %v597_v43 }
 0x120   :  { %v937_v15 = vmul.f32 %v2176_v6, %v844_v42 }
 0x121   :  { %1795 = vst [vmem:[#allocation2 + $0x38] sm:$0xff] %v1667_v44   ;;  %v906_v21 = vmul.f32 %v2176_v6, %v767_v46 }
 0x122   :  { %v1005_v47 = vadd.f32 %v2184_v10, %v937_v15  ;;  %v856_v5 = vpop.f32.mrf.mxu3 }
 0x123   :  { %v773_v48 = vpop.f32.mrf.mxu1  ;;  %v974_v60 = vadd.f32 %v2184_v10, %v906_v21 }
 0x124   :  { %v1069_v56 = vmax.f32 %v1005_v47, 0.0 }
 0x125   :  { %v677_v8 = vpop.f32.mrf.mxu2  ;;  %v1038_v0 = vmax.f32 %v974_v60, 0.0 }
 0x126   :  { %v1747_v12 = vpack.c.bf16 %v1069_v56, %v1068_v55  ;;  %v599_v50 = vpop.f32.mrf.mxu0  ;;  %v847_v57 = vadd.f32 %v2430_v58, %v677_v8 }
 0x127   :  { %v769_v39 = vadd.f32 %v768_v23, %v599_v50 }
 0x128   :  { %1811 = vst [vmem:[#allocation2 + $0xb8] sm:$0xff] %v1747_v12   ;;  %v938_v63 = vmul.f32 %v2176_v6, %v847_v57 }
 0x129   :  { %v907_v61 = vmul.f32 %v2176_v6, %v769_v39 }
 0x12a   :  { %v1006_v13 = vadd.f32 %v2184_v10, %v938_v63  ;;  %v858_v25 = vpop.f32.mrf.mxu3 }
 0x12b   :  { %v776_v62 = vpop.f32.mrf.mxu1  ;;  %v975_v53 = vadd.f32 %v2184_v10, %v907_v61 }
 0x12c   :  { %v1070_v59 = vmax.f32 %v1006_v13, 0.0 }
 0x12d   :  { %v1039_v1 = vmax.f32 %v975_v53, 0.0  ;;  %v679_v2 = vpop.f32.mrf.mxu2 }
 0x12e   :  { %v849_v33 = vadd.f32 %v848_v20, %v679_v2  ;;  %v602_v3 = vpop.f32.mrf.mxu0 }
 0x12f   :  { %v1672_v4 = vpack.c.bf16 %v1039_v1, %v1038_v0  ;;  %v772_v14 = vadd.f32 %v771_v51, %v602_v3 }
 0x130   :  { %v939_v58 = vmul.f32 %v2176_v6, %v849_v33 }
 0x131   :  { %1796 = vst [vmem:[#allocation2 + $0x40] sm:$0xff] %v1672_v4   ;;  %v908_v17 = vmul.f32 %v2176_v6, %v772_v14 }
 0x132   :  { %v1007_v30 = vadd.f32 %v2184_v10, %v939_v58  ;;  %v861_v32 = vpop.f32.mrf.mxu3 }
 0x133   :  { %v778_v37 = vpop.f32.mrf.mxu1  ;;  %v976_v23 = vadd.f32 %v2184_v10, %v908_v17 }
 0x134   :  { %v1071_v16 = vmax.f32 %v1007_v30, 0.0 }
 0x135   :  { %v682_v18 = vpop.f32.mrf.mxu2  ;;  %v1040_v29 = vmax.f32 %v976_v23, 0.0 }
 0x136   :  { %v1752_v19 = vpack.c.bf16 %v1071_v16, %v1070_v59  ;;  %v604_v9 = vpop.f32.mrf.mxu0  ;;  %v852_v22 = vadd.f32 %v851_v36, %v682_v18 }
 0x137   :  { %v774_v20 = vadd.f32 %v773_v48, %v604_v9 }
 0x138   :  { %1812 = vst [vmem:[#allocation2 + $0xc0] sm:$0xff] %v1752_v19   ;;  %v940_v28 = vmul.f32 %v2176_v6, %v852_v22 }
 0x139   :  { %v909_v24 = vmul.f32 %v2176_v6, %v774_v20 }
 0x13a   :  { %v1008_v7 = vadd.f32 %v2184_v10, %v940_v28  ;;  %v863_v57 = vpop.f32.mrf.mxu3 }
 0x13b   :  { %v781_v27 = vpop.f32.mrf.mxu1  ;;  %v977_v49 = vadd.f32 %v2184_v10, %v909_v24 }
 0x13c   :  { %v1072_v42 = vmax.f32 %v1008_v7, 0.0 }
 0x13d   :  { %v1041_v54 = vmax.f32 %v977_v49, 0.0  ;;  %v684_v34 = vpop.f32.mrf.mxu2 }
 0x13e   :  { %v854_v35 = vadd.f32 %v853_v52, %v684_v34  ;;  %v607_v26 = vpop.f32.mrf.mxu0 }
 0x13f   :  { %v1677_v51 = vpack.c.bf16 %v1041_v54, %v1040_v29  ;;  %v777_v38 = vadd.f32 %v776_v62, %v607_v26 }
 0x140   :  { %v941_v36 = vmul.f32 %v2176_v6, %v854_v35 }
 0x141   :  { %1797 = vst [vmem:[#allocation2 + $0x48] sm:$0xff] %v1677_v51   ;;  %v910_v44 = vmul.f32 %v2176_v6, %v777_v38 }
 0x142   :  { %v1009_v40 = vadd.f32 %v2184_v10, %v941_v36  ;;  %v866_v30 = vpop.f32.mrf.mxu3 }
 0x143   :  { %v783_v41 = vpop.f32.mrf.mxu1  ;;  %v978_v55 = vadd.f32 %v2184_v10, %v910_v44 }
 0x144   :  { %v1073_v43 = vmax.f32 %v1009_v40, 0.0 }
 0x145   :  { %v687_v45 = vpop.f32.mrf.mxu2  ;;  %v1042_v12 = vmax.f32 %v978_v55, 0.0 }
 0x146   :  { %v1757_v15 = vpack.c.bf16 %v1073_v43, %v1072_v42  ;;  %v609_v46 = vpop.f32.mrf.mxu0  ;;  %v857_v48 = vadd.f32 %v856_v5, %v687_v45 }
 0x147   :  { %v779_v47 = vadd.f32 %v778_v37, %v609_v46 }
 0x148   :  { %1813 = vst [vmem:[#allocation2 + $0xc8] sm:$0xff] %v1757_v15   ;;  %v942_v52 = vmul.f32 %v2176_v6, %v857_v48 }
 0x149   :  { %v911_v56 = vmul.f32 %v2176_v6, %v779_v47 }
 0x14a   :  { %v1010_v53 = vadd.f32 %v2184_v10, %v942_v52  ;;  %v868_v29 = vpop.f32.mrf.mxu3 }
 0x14b   :  { %v786_v21 = vpop.f32.mrf.mxu1  ;;  %v979_v8 = vadd.f32 %v2184_v10, %v911_v56 }
 0x14c   :  { %v1074_v33 = vmax.f32 %v1010_v53, 0.0 }
 0x14d   :  { %v1043_v50 = vmax.f32 %v979_v8, 0.0  ;;  %v689_v39 = vpop.f32.mrf.mxu2 }
 0x14e   :  { %v859_v60 = vadd.f32 %v858_v25, %v689_v39  ;;  %v612_v61 = vpop.f32.mrf.mxu0 }
 0x14f   :  { %v1682_v62 = vpack.c.bf16 %v1043_v50, %v1042_v12  ;;  %v782_v0 = vadd.f32 %v781_v27, %v612_v61 }
 0x150   :  { %v943_v63 = vmul.f32 %v2176_v6, %v859_v60 }
 0x151   :  { %1798 = vst [vmem:[#allocation2 + $0x50] sm:$0xff] %v1682_v62   ;;  %v912_v4 = vmul.f32 %v2176_v6, %v782_v0 }
 0x152   :  { %v1011_v1 = vadd.f32 %v2184_v10, %v943_v63  ;;  %v871_v45 = vpop.f32.mrf.mxu3 }
 0x153   :  { %v788_v2 = vpop.f32.mrf.mxu1  ;;  %v980_v59 = vadd.f32 %v2184_v10, %v912_v4 }
 0x154   :  { %v1075_v3 = vmax.f32 %v1011_v1, 0.0 }
 0x155   :  { %v692_v5 = vpop.f32.mrf.mxu2  ;;  %v1044_v9 = vmax.f32 %v980_v59, 0.0 }
 0x156   :  { %v1762_v13 = vpack.c.bf16 %v1075_v3, %v1074_v33  ;;  %v614_v58 = vpop.f32.mrf.mxu0  ;;  %v862_v37 = vadd.f32 %v861_v32, %v692_v5 }
 0x157   :  { %v784_v14 = vadd.f32 %v783_v41, %v614_v58 }
 0x158   :  { %1814 = vst [vmem:[#allocation2 + $0xd0] sm:$0xff] %v1762_v13   ;;  %v944_v19 = vmul.f32 %v2176_v6, %v862_v37 }
 0x159   :  { %v913_v16 = vmul.f32 %v2176_v6, %v784_v14 }
 0x15a   :  { %v1012_v27 = vadd.f32 %v2184_v10, %v944_v19  ;;  %v873_v53 = vpop.f32.mrf.mxu3 }
 0x15b   :  { %v791_v17 = vpop.f32.mrf.mxu1  ;;  %v981_v18 = vadd.f32 %v2184_v10, %v913_v16 }
 0x15c   :  { %v1076_v35 = vmax.f32 %v1012_v27, 0.0 }
 0x15d   :  { %v1045_v20 = vmax.f32 %v981_v18, 0.0  ;;  %v694_v22 = vpop.f32.mrf.mxu2 }
 0x15e   :  { %v864_v23 = vadd.f32 %v863_v57, %v694_v22  ;;  %v617_v24 = vpop.f32.mrf.mxu0 }
 0x15f   :  { %v1687_v25 = vpack.c.bf16 %v1045_v20, %v1044_v9  ;;  %v787_v28 = vadd.f32 %v786_v21, %v617_v24 }
 0x160   :  { %v945_v49 = vmul.f32 %v2176_v6, %v864_v23 }
 0x161   :  { %1799 = vst [vmem:[#allocation2 + $0x58] sm:$0xff] %v1687_v25   ;;  %v914_v51 = vmul.f32 %v2176_v6, %v787_v28 }
 0x162   :  { %v1013_v54 = vadd.f32 %v2184_v10, %v945_v49 }
 0x163   :  { %v793_v34 = vpop.f32.mrf.mxu1  ;;  %v982_v32 = vadd.f32 %v2184_v10, %v914_v51 }
 0x164   :  { %v1077_v26 = vmax.f32 %v1013_v54, 0.0 }
 0x165   :  { %v697_v7 = vpop.f32.mrf.mxu2  ;;  %v1046_v46 = vmax.f32 %v982_v32, 0.0 }
 0x166   :  { %v1767_v36 = vpack.c.bf16 %v1077_v26, %v1076_v35  ;;  %v619_v38 = vpop.f32.mrf.mxu0  ;;  %v867_v41 = vadd.f32 %v866_v30, %v697_v7 }
 0x167   :  { %v789_v40 = vadd.f32 %v788_v2, %v619_v38 }
 0x168   :  { %1815 = vst [vmem:[#allocation2 + $0xd8] sm:$0xff] %v1767_v36   ;;  %v946_v15 = vmul.f32 %v2176_v6, %v867_v41 }
 0x169   :  { %v915_v42 = vmul.f32 %v2176_v6, %v789_v40 }
 0x16a   :  { %v1014_v8 = vadd.f32 %v2184_v10, %v946_v15 }
 0x16b   :  { %v796_v43 = vpop.f32.mrf.mxu1  ;;  %v983_v44 = vadd.f32 %v2184_v10, %v915_v42 }
 0x16c   :  { %v1078_v57 = vmax.f32 %v1014_v8, 0.0 }
 0x16d   :  { %v1047_v47 = vmax.f32 %v983_v44, 0.0  ;;  %v699_v48 = vpop.f32.mrf.mxu2 }
 0x16e   :  { %v869_v55 = vadd.f32 %v868_v29, %v699_v48  ;;  %v622_v56 = vpop.f32.mrf.mxu0 }
 0x16f   :  { %v1692_v21 = vpack.c.bf16 %v1047_v47, %v1046_v46  ;;  %v792_v12 = vadd.f32 %v791_v17, %v622_v56  ;;  %v876_v17 = vpop.f32.mrf.mxu3 }
 0x170   :  { %v947_v52 = vmul.f32 %v2176_v6, %v869_v55 }
 0x171   :  { %1800 = vst [vmem:[#allocation2 + $0x60] sm:$0xff] %v1692_v21   ;;  %v916_v61 = vmul.f32 %v2176_v6, %v792_v12  ;;  %v1835_v12 = vld [vmem:[%s2536_s2] ss:$0 sm:$0xff]  ;;  %s1863_s2 = smov [#allocation2]  }
 0x172   :  { %v1015_v50 = vadd.f32 %v2184_v10, %v947_v52 }
 0x173   :  { %v798_v39 = vpop.f32.mrf.mxu1  ;;  %v984_v33 = vadd.f32 %v2184_v10, %v916_v61  ;;  %v1836_v61 = vld [vmem:[%s2537_s3] ss:$0 sm:$0xff]  ;;  %s1218_s3 = sshll.u32 %s1863_s2, 4  ;;  %s1219_s3 = int_to_ptr.vmem [resolvable:$true] %s1218_s3 }
 0x174   :  { %v1079_v60 = vmax.f32 %v1015_v50, 0.0 }
 0x175   :  { %v702_v62 = vpop.f32.mrf.mxu2  ;;  %v1048_v58 = vmax.f32 %v984_v33, 0.0 }
 0x176   :  { %v1772_v63 = vpack.c.bf16 %v1079_v60, %v1078_v57  ;;  %v624_v0 = vpop.f32.mrf.mxu0  ;;  %v872_v2 = vadd.f32 %v871_v45, %v702_v62 }
 0x177   :  { %v794_v1 = vadd.f32 %v793_v34, %v624_v0  ;;  %v878_v35 = vpop.f32.mrf.mxu3 }
 0x178   :  { %1816 = vst [vmem:[#allocation2 + $0xe0] sm:$0xff] %v1772_v63   ;;  %v948_v13 = vmul.f32 %v2176_v6, %v872_v2 }
 0x179   :  { %v917_v3 = vmul.f32 %v2176_v6, %v794_v1 }
 0x17a   :  { %v1016_v18 = vadd.f32 %v2184_v10, %v948_v13 }
 0x17b   :  { %v801_v4 = vpop.f32.mrf.mxu1  ;;  %v985_v5 = vadd.f32 %v2184_v10, %v917_v3 }
 0x17c   :  { %v1080_v23 = vmax.f32 %v1016_v18, 0.0 }
 0x17d   :  { %v1049_v14 = vmax.f32 %v985_v5, 0.0  ;;  %v704_v30 = vpop.f32.mrf.mxu2 }
 0x17e   :  { %v874_v37 = vadd.f32 %v873_v53, %v704_v30  ;;  %v627_v59 = vpop.f32.mrf.mxu0 }
 0x17f   :  { %v1697_v16 = vpack.c.bf16 %v1049_v14, %v1048_v58  ;;  %v797_v9 = vadd.f32 %v796_v43, %v627_v59  ;;  %v881_v56 = vpop.f32.mrf.mxu3 }
 0x180   :  { %v949_v19 = vmul.f32 %v2176_v6, %v874_v37 }
 0x181   :  { %1801 = vst [vmem:[#allocation2 + $0x68] sm:$0xff] %v1697_v16   ;;  %v918_v25 = vmul.f32 %v2176_v6, %v797_v9 }
 0x182   :  { %v1017_v20 = vadd.f32 %v2184_v10, %v949_v19 }
 0x183   :  { %v803_v22 = vpop.f32.mrf.mxu1  ;;  %v986_v34 = vadd.f32 %v2184_v10, %v918_v25 }
 0x184   :  { %v1081_v24 = vmax.f32 %v1017_v20, 0.0 }
 0x185   :  { %v707_v27 = vpop.f32.mrf.mxu2  ;;  %v1050_v38 = vmax.f32 %v986_v34, 0.0 }
 0x186   :  { %v1777_v49 = vpack.c.bf16 %v1081_v24, %v1080_v23  ;;  %v629_v28 = vpop.f32.mrf.mxu0  ;;  %v877_v54 = vadd.f32 %v876_v17, %v707_v27 }
 0x187   :  { %v799_v29 = vadd.f32 %v798_v39, %v629_v28  ;;  %v883_v5 = vpop.f32.mrf.mxu3 }
 0x188   :  { %1817 = vst [vmem:[#allocation2 + $0xe8] sm:$0xff] %v1777_v49   ;;  %v950_v36 = vmul.f32 %v2176_v6, %v877_v54 }
 0x189   :  { %v919_v26 = vmul.f32 %v2176_v6, %v799_v29 }
 0x18a   :  { %v1018_v45 = vadd.f32 %v2184_v10, %v950_v36 }
 0x18b   :  { %v806_v51 = vpop.f32.mrf.mxu1  ;;  %v987_v7 = vadd.f32 %v2184_v10, %v919_v26 }
 0x18c   :  { %v807_v41 = vadd.f32 %v806_v51, %v2186_v11  ;;  %v1082_v8 = vmax.f32 %v1018_v45, 0.0 }
 0x18d   :  { %v1051_v40 = vmax.f32 %v987_v7, 0.0  ;;  %v709_v32 = vpop.f32.mrf.mxu2 }
 0x18e   :  { %v879_v42 = vadd.f32 %v878_v35, %v709_v32  ;;  %v632_v43 = vpop.f32.mrf.mxu0  ;;  %v922_v46 = vmul.f32 %v2176_v6, %v807_v41 }
 0x18f   :  { %v1702_v44 = vpack.c.bf16 %v1051_v40, %v1050_v38  ;;  %v802_v47 = vadd.f32 %v801_v4, %v632_v43 }
 0x190   :  { %v951_v15 = vmul.f32 %v2176_v6, %v879_v42  ;;  %v990_v52 = vadd.f32 %v2184_v10, %v922_v46 }
 0x191   :  { %1802 = vst [vmem:[#allocation2 + $0x70] sm:$0xff] %v1702_v44   ;;  %v920_v50 = vmul.f32 %v1835_v12, %v802_v47 }
 0x192   :  { %v1019_v48 = vadd.f32 %v2184_v10, %v951_v15  ;;  %v1054_v63 = vmax.f32 %v990_v52, 0.0 }
 0x193   :  { %v808_v55 = vpop.f32.mrf.mxu1  ;;  %v988_v0 = vadd.f32 %v1836_v61, %v920_v50 }
 0x194   :  { %v809_v21 = vadd.f32 %v808_v55, %v2217_v31  ;;  %v1083_v11 = vmax.f32 %v1019_v48, 0.0 }
 0x195   :  { %v712_v57 = vpop.f32.mrf.mxu2  ;;  %v1052_v4 = vmax.f32 %v988_v0, 0.0 }
 0x196   :  { %v923_v39 = vmul.f32 %v1835_v12, %v809_v21  ;;  %v1782_v60 = vpack.c.bf16 %v1083_v11, %v1082_v8  ;;  %v634_v6 = vpop.f32.mrf.mxu0  ;;  %v882_v31 = vadd.f32 %v881_v56, %v712_v57 }
 0x197   :  { %v804_v53 = vadd.f32 %v803_v22, %v634_v6 }
 0x198   :  { %v991_v62 = vadd.f32 %v1836_v61, %v923_v39  ;;  %1818 = vst [vmem:[#allocation2 + $0xf0] sm:$0xff] %v1782_v60   ;;  %v952_v3 = vmul.f32 %v1835_v12, %v882_v31 }
 0x199   :  { %v921_v1 = vmul.f32 %v1835_v12, %v804_v53 }
 0x19a   :  { %v1055_v10 = vmax.f32 %v991_v62, 0.0  ;;  %v1020_v37 = vadd.f32 %v1836_v61, %v952_v3 }
 0x19b   :  { %v989_v33 = vadd.f32 %v1836_v61, %v921_v1 }
 0x19c   :  { %v1712_v2 = vpack.c.bf16 %v1055_v10, %v1054_v63  ;;  %v1084_v17 = vmax.f32 %v1020_v37, 0.0 }
 0x19d   :  { %v1053_v13 = vmax.f32 %v989_v33, 0.0  ;;  %v714_v58 = vpop.f32.mrf.mxu2 }
 0x19e   :  { %1804 = vst [vmem:[#allocation2 + $0x80] sm:$0xff] %v1712_v2   ;;  %v884_v14 = vadd.f32 %v883_v5, %v714_v58 }
 0x19f   :  { %v1707_v30 = vpack.c.bf16 %v1053_v13, %v1052_v4 }
 0x1a0   :  { %v953_v59 = vmul.f32 %v1835_v12, %v884_v14 }
 0x1a1   :  { %1803 = vst [vmem:[#allocation2 + $0x78] sm:$0xff] %v1707_v30  }
 0x1a2   :  { %v1021_v16 = vadd.f32 %v1836_v61, %v953_v59 }
 0x1a4   :  { %v1085_v18 = vmax.f32 %v1021_v16, 0.0 }
 0x1a6   :  { %v1787_v19 = vpack.c.bf16 %v1085_v18, %v1084_v17 }
 0x1a8   :  { %1819 = vst [vmem:[#allocation2 + $0xf8] sm:$0xff] %v1787_v19  }
 0x1a9   :  { %1226 = dma.vmem_to_hbm [thread:$0]  %s1219_s3, 4096, %s1221_s5, [#allocation3], %s1864_s6, %s1864_s6, %s1865_s1  }
 0x1aa   :  { %1861 = dma.done.wait [#allocation3], 4096  }
 0x1ab   :  { %1862 = vsyncadd [#allocation3], 4294963200 }
 0x1ac   :  { %1231 = vsyncpa [#allocation3], 1 }

</bundles_post_ra>
